<compile_context>
chip_gen: v7x
topology: tpu7x:2x2x1
jax: 0.10.0
libtpu: 0.0.40
codegen_flags: <defaults>
</compile_context>

<pallas_src>
import jax
import jax.numpy as jnp
from jax.experimental import pallas as pl
from jax.experimental.pallas import tpu as pltpu


_STRIPE_BYTES_THRESHOLD = 8 * 1024 * 1024  # only stripe big copies
_MAX_STRIPES = 4


def _make_dma_copy_kernel(num_stripes: int, stripe_len: int):
    """Build a kernel body doing `num_stripes` concurrent HBM->HBM DMAs."""

    if num_stripes == 1:
        def kernel(x_ref, o_ref, sems):
            cp = pltpu.make_async_copy(x_ref, o_ref, sems.at[0])
            cp.start()
            cp.wait()
        return kernel

    def kernel(x_ref, o_ref, sems):
        copies = []
        for s in range(num_stripes):  # static unroll over stripes
            src = x_ref.at[pl.ds(s * stripe_len, stripe_len)]
            dst = o_ref.at[pl.ds(s * stripe_len, stripe_len)]
            cp = pltpu.make_async_copy(src, dst, sems.at[s])
            cp.start()
            copies.append(cp)
        for cp in copies:
            cp.wait()

    return kernel


def _pick_num_stripes(shape, itemsize: int) -> int:
    """1 for small copies; up to 4 stripes along dim 0 for big ones."""
    if not shape:
        return 1
    nbytes = itemsize
    for d in shape:
        nbytes *= d
    if nbytes < _STRIPE_BYTES_THRESHOLD:
        return 1
    lead = shape[0]
    for ns in range(min(_MAX_STRIPES, lead), 0, -1):
        if lead % ns == 0:
            return ns
    return 1


def identity_adapter(x: jax.Array) -> jax.Array:
    """Pallas implementation of IdentityAdapter.forward(x) -> x.

    Materializes the output with a direct HBM->HBM DMA copy.
    (Semantically, returning `x` directly is equivalent and cheaper; the
    kernel is invoked so the forward pass runs on-device as requested.)
    """
    if x.size == 0:
        return x  # nothing to copy

    orig_shape = x.shape
    reshaped = False
    if x.ndim == 0:
        x = x.reshape(1)  # DMA wants >= 1-D refs
        reshaped = True

    num_stripes = _pick_num_stripes(x.shape, jnp.dtype(x.dtype).itemsize)
    stripe_len = x.shape[0] // num_stripes

    out = pl.pallas_call(
        _make_dma_copy_kernel(num_stripes, stripe_len),
        out_shape=jax.ShapeDtypeStruct(x.shape, x.dtype),
        in_specs=[pl.BlockSpec(memory_space=pl.ANY)],
        out_specs=pl.BlockSpec(memory_space=pl.ANY),
        scratch_shapes=[pltpu.SemaphoreType.DMA((num_stripes,))],
    )(x)

    return out.reshape(orig_shape) if reshaped else out


if __name__ == "__main__":
    key = jax.random.PRNGKey(0)
    # Shape consistent with a typical NCHW conv-style input: (B, C, H, W).
    x = jax.random.normal(key, (2, 4, 16, 16), dtype=jnp.float32)

    y = identity_adapter(x)
    jax.block_until_ready(y)

    assert y.shape == x.shape, (y.shape, x.shape)
    assert y.dtype == x.dtype, (y.dtype, x.dtype)
    assert bool(jnp.all(y == x)), "Identity kernel output mismatch"

    print("KERNEL_OK")
</pallas_src>

<mosaic_0001>
module attributes {stable_mosaic.version = 11 : i64} {
  func.func @kernel(%arg0: memref<2x4x16x16xf32, #tpu.memory_space<any>>, %arg1: memref<2x4x16x16xf32, #tpu.memory_space<any>>, %arg2: memref<1x!tpu.dma_semaphore, #tpu.memory_space<semaphore_mem>>) attributes {dimension_semantics = [], scalar_prefetch = 0 : i64, scratch_operands = 1 : i64, tpu.core_type = #tpu.core_type<tc>} {
    %c0_i32 = arith.constant 0 : i32
    %0 = tpu.memref_slice %arg2[%c0_i32] : memref<1x!tpu.dma_semaphore, #tpu.memory_space<semaphore_mem>> -> memref<1x!tpu.dma_semaphore, #tpu.memory_space<semaphore_mem>>
    %1 = tpu.memref_squeeze %0 : memref<1x!tpu.dma_semaphore, #tpu.memory_space<semaphore_mem>> -> memref<!tpu.dma_semaphore, #tpu.memory_space<semaphore_mem>>
    tpu.enqueue_dma source(%arg0 : memref<2x4x16x16xf32, #tpu.memory_space<any>>) target(%arg1 : memref<2x4x16x16xf32, #tpu.memory_space<any>>) target_semaphore(%1 : memref<!tpu.dma_semaphore, #tpu.memory_space<semaphore_mem>>)
    %c0_i32_0 = arith.constant 0 : i32
    %2 = tpu.memref_slice %arg2[%c0_i32_0] : memref<1x!tpu.dma_semaphore, #tpu.memory_space<semaphore_mem>> -> memref<1x!tpu.dma_semaphore, #tpu.memory_space<semaphore_mem>>
    %3 = tpu.memref_squeeze %2 : memref<1x!tpu.dma_semaphore, #tpu.memory_space<semaphore_mem>> -> memref<!tpu.dma_semaphore, #tpu.memory_space<semaphore_mem>>
    tpu.wait_dma2 semaphore(%3 : memref<!tpu.dma_semaphore, #tpu.memory_space<semaphore_mem>>) src(%arg0 : memref<2x4x16x16xf32, #tpu.memory_space<any>>) dst(%arg1 : memref<2x4x16x16xf32, #tpu.memory_space<any>>)
    return
  }
}

</mosaic_0001>

<bundles_post_ra>
// kernel: tpu_custom_call.1
= control target key start
LH: loop header
LB: loop body
LE: loop exit
PB: predicated region body
PF: predicated region fallthrough
CT: control target
= control target key end

     0   :  { %s36_s6 = smov [#allocation2]   ;;  %s37_s7 = smov [#allocation3]   ;;  %s55_s0 = inlined_call_operand.hbm [shape: f32[2,4,16,16], index: 0, kind: input, shape index: {}]   ;;  %s56_s1 = inlined_call_operand.hbm [shape: f32[2,4,16,16], index: 1, kind: output, shape index: {}]  }
   0x1   :  { %s38_s8 = smov 0  }
   0x2   :  { %18 = dma.general %s55_s0, 2048, %s56_s1, %s36_s6, %s37_s7, [#allocation4], %s38_s8, 0  }
   0x3   :  { %34 = dma.done.wait [#allocation2], 2048 }
   0x4   :  { %35 = vsyncadd [#allocation2], 4294965248 }
   0x5   :  { %24 = vsyncmov [#allocation2] }
   0x8   :  { %s25_s13 = vpop.sfrf %24 }
   0x9   :  { %p30_p0 = scmp.ne.s32.totalorder %s25_s13, 0 }
   0xb   :  { %29 = shalt.err (%p30_p0)  }

</bundles_post_ra>
